<compile_context>
chip_gen: v7x
topology: tpu7x:2x2x1
jax: 0.10.0
libtpu: 0.0.40
codegen_flags: <defaults>
</compile_context>

<pallas_src>
import jax
import jax.numpy as jnp
from jax.experimental import pallas as pl
from jax.experimental.pallas import tpu as pltpu


def _bigram_kernel(idx_ref, table_ref, out_ref):
    """idx_ref: (Mp, 1) int32, table_ref: (Vp, Vp) f32, out_ref: (Mp, Vp) f32."""
    idx = idx_ref[...]                      # (Mp, 1) int32
    Mp = idx.shape[0]
    Vp = table_ref.shape[0]

    # One-hot selection (Mp, Vp) on the VPU; padded K columns stay zero because
    # every real token id is < V <= Vp and padded rows hold id 0 (sliced later).
    iota = jax.lax.broadcasted_iota(jnp.int32, (Mp, Vp), 1)
    one_hot = (idx == iota).astype(table_ref.dtype)

    # Embedding lookup == one_hot @ table (contract over padded vocab) on MXU.
    out_ref[...] = jnp.dot(
        one_hot, table_ref[...], preferred_element_type=jnp.float32
    ).astype(out_ref.dtype)


def bigram_forward(idx, table):
    """Pallas wrapper: logits = table[idx], shape (B, T, V)."""
    B, T = idx.shape
    V, V2 = table.shape
    assert V == V2, "bigram table must be square (vocab, vocab)"

    LANE = 128
    SUBLANE = 8
    Vp = ((V + LANE - 1) // LANE) * LANE            # lane-dense vocab (K and N)
    M = B * T
    Mp = ((M + SUBLANE - 1) // SUBLANE) * SUBLANE   # sublane-aligned token count

    # Wrapper-side layout plumbing (cheap relative to in-kernel relayouts).
    table_p = jnp.zeros((Vp, Vp), table.dtype).at[:V, :V].set(table)
    idx_flat = jnp.zeros((Mp, 1), jnp.int32).at[:M, 0].set(
        idx.reshape(M).astype(jnp.int32))

    cost = pl.CostEstimate(
        flops=2 * Mp * Vp * Vp,
        transcendentals=0,
        bytes_accessed=(idx_flat.size * 4 + table_p.size * 4 + Mp * Vp * 4),
    )

    out_p = pl.pallas_call(
        _bigram_kernel,
        out_shape=jax.ShapeDtypeStruct((Mp, Vp), table.dtype),
        # Tiny problem: no grid — whole (padded) arrays live in VMEM for one
        # program invocation. Block shapes equal the full array shapes.
        in_specs=[
            pl.BlockSpec((Mp, 1), lambda: (0, 0)),
            pl.BlockSpec((Vp, Vp), lambda: (0, 0)),
        ],
        out_specs=pl.BlockSpec((Mp, Vp), lambda: (0, 0)),
        cost_estimate=cost,
        compiler_params=pltpu.CompilerParams(),
    )(idx_flat, table_p)

    # Strip padding OUTSIDE the kernel and restore (B, T, V).
    return out_p[:M, :V].reshape(B, T, V)


if __name__ == "__main__":
    # Deterministic synthetic setup mirroring the training script's tiny sizes:
    # batch_size=4, block_size=8, vocab_size=65 (tiny-shakespeare chars).
    vocab_size = 65
    batch_size = 4
    block_size = 8

    key = jax.random.PRNGKey(0)
    k_table, k_idx = jax.random.split(key)

    # nn.Embedding default init: N(0, 1).
    token_embedding_table = jax.random.normal(
        k_table, (vocab_size, vocab_size), dtype=jnp.float32)
    idx = jax.random.randint(
        k_idx, (batch_size, block_size), 0, vocab_size, dtype=jnp.int32)

    logits = bigram_forward(idx, token_embedding_table)
    logits = jax.block_until_ready(logits)

    # Reference check against plain JAX embedding lookup (exact gather).
    ref = token_embedding_table[idx]
    assert logits.shape == (batch_size, block_size, vocab_size)
    assert jnp.allclose(logits, ref, atol=1e-5, rtol=1e-5)

    print("KERNEL_OK")
</pallas_src>

<mosaic_0001>
module attributes {stable_mosaic.version = 11 : i64} {
  func.func @_bigram_kernel(%arg0: memref<32x1xi32, #tpu.memory_space<vmem>>, %arg1: memref<128x128xf32, #tpu.memory_space<vmem>>, %arg2: memref<32x128xf32, #tpu.memory_space<vmem>>) attributes {dimension_semantics = [], scalar_prefetch = 0 : i64, scratch_operands = 0 : i64, tpu.core_type = #tpu.core_type<tc>} {
    %c0 = arith.constant 0 : index
    %c0_0 = arith.constant 0 : index
    %0 = vector.load %arg0[%c0, %c0_0] : memref<32x1xi32, #tpu.memory_space<vmem>>, vector<32x1xi32>
    %1 = tpu.iota {dimensions = array<i32: 1>} : vector<32x128xi32>
    %2 = vector.broadcast %0 : vector<32x1xi32> to vector<32x128xi32>
    %3 = arith.cmpi eq, %2, %1 : vector<32x128xi32>
    %4 = arith.extui %3 : vector<32x128xi1> to vector<32x128xi32>
    %5 = arith.sitofp %4 : vector<32x128xi32> to vector<32x128xf32>
    %c0_1 = arith.constant 0 : index
    %c0_2 = arith.constant 0 : index
    %6 = vector.load %arg1[%c0_1, %c0_2] : memref<128x128xf32, #tpu.memory_space<vmem>>, vector<128x128xf32>
    %cst = arith.constant dense<0.000000e+00> : vector<32x128xf32>
    %7 = tpu.matmul %5, %6, %cst {dimension_numbers = #tpu.dot_dimension_numbers<[1], [0], [0], [1], [0, 0, 1, 1], [], []>} : vector<32x128xf32>, vector<128x128xf32>, vector<32x128xf32> -> vector<32x128xf32>
    %c0_3 = arith.constant 0 : index
    %c0_4 = arith.constant 0 : index
    %8 = vector.load %arg2[%c0_3, %c0_4] : memref<32x128xf32, #tpu.memory_space<vmem>>, vector<32x128xf32>
    tpu.vector_store %arg2[%c0_3, %c0_4], %7 {strides = array<i32>} : memref<32x128xf32, #tpu.memory_space<vmem>>, vector<32x128xf32>,
    return
  }
}

</mosaic_0001>

<bundles_post_ra>
// kernel: tpu_custom_call.1
= control target key start
LH: loop header
LB: loop body
LE: loop exit
PB: predicated region body
PF: predicated region fallthrough
CT: control target
= control target key end

     0   :  { %7 = vsyncpa [#allocation3], 0  ;;  %s411_s0 = inlined_call_operand.vmem [shape: s32[32,1], index: 0, kind: input, shape index: {}]   ;;  %s412_s1 = inlined_call_operand.hbm [shape: f32[128,128], index: 1, kind: input, shape index: {}]   ;;  %s413_s2 = inlined_call_operand.hbm [shape: f32[32,128], index: 2, kind: output, shape index: {}]  }
   0x1   :  { %8 = vsyncpa [#allocation4], 0  ;;  %s348_s9 = smov [#allocation2]   ;;  %s300_s13 = scalar_lea.hbm %s412_s1, 2048 }
   0x2   :  { %s16_s10 = sshll.u32 %s348_s9, 4  ;;  %p301_p0 = scmp.ne.s32.totalorder %s412_s1, %s300_s13  ;;  %s17_s10 = int_to_ptr.vmem [resolvable:$true] %s16_s10 }
   0x3   :  { %p304_p1 = scmp.lt.u32.totalorder %s300_s13, %s412_s1 }
   0x5   :  { %p306_p2 = pnand %p304_p1, %p301_p0 }
   0x7   :  { %309 = shalt.err (!%p306_p2)
}
   0x8   :  { %s310_s18 = scalar_lea.vmem %s17_s10, 2048  ;;  %p315_p4 = scmp.lt.s32.totalorder %s17_s10, %s17_s10 }
   0x9   :  { %p311_p3 = scmp.ne.s32.totalorder %s17_s10, %s310_s18  ;;  %p316_p5 = scmp.lt.s32.totalorder %s310_s18, %s310_s18 }
   0xb   :  { %p317_p6 = por %p316_p5, %p315_p4 }
   0xd   :  { %p318_p7 = pnand %p317_p6, %p311_p3 }
   0xf   :  { %321 = shalt.err (!%p318_p7)
}
  0x10   :  { %s349_s19 = smov 128   ;;  %s350_s20 = smov 8  }
  0x11   :  { %22 = dma.hbm_to_vmem [thread:$0]  %s412_s1, 2048, %s17_s10, [#allocation3], %s349_s19, %s349_s19, %s350_s20  }
  0x12   :  { %344 = dma.done.wait [#allocation3], 2048  }
  0x13   :  { %345 = vsyncadd [#allocation3], 4294965248  ;;  %v351_v0 = vmov 0   ;;  %v27_v1 = vld [vmem:[%s411_s0 + $0x8] sm:$0xff]  ;;  %v26_v2 = vld [vmem:[%s411_s0] sm:$0xff]  ;;  %v30_v29 = vlaneseq  ;;  %v352_v33 = vmov 1.0  }
  0x14   :  { %299 = vset.pattern.permute.xlu1 %v351_v0  ;;  %298 = vset.pattern.permute.xlu0 %v351_v0  ;;  %v29_v3 = vld [vmem:[%s411_s0 + $0x18] sm:$0xff]  ;;  %v56_v4 = vld [vmem:[#allocation2] sm:$0xff]  ;;  %v57_v5 = vld [vmem:[#allocation2 + $0x8] sm:$0xff] }
  0x15   :  { %36 = vperm.xlu1 %299, %v27_v1   ;;  %33 = vperm.xlu0 %298, %v26_v2   ;;  %v28_v6 = vld [vmem:[%s411_s0 + $0x10] sm:$0xff]  ;;  %v244_v7 = vpack.c.bf16 %v57_v5, %v56_v4  ;;  %v59_v9 = vld [vmem:[#allocation2 + $0x18] sm:$0xff]  ;;  %v60_v11 = vld [vmem:[#allocation2 + $0x20] sm:$0xff]  ;;  %v31_v30 = vand.u32 127, %v30_v29  ;;  %s353_s0 = smov [#allocation5]  }
  0x16   :  { %v58_v8 = vld [vmem:[#allocation2 + $0x10] sm:$0xff]  ;;  %v61_v12 = vld [vmem:[#allocation2 + $0x28] sm:$0xff]  ;;  %v63_v15 = vld [vmem:[#allocation2 + $0x38] sm:$0xff]  ;;  %s166_s30 = sshll.u32 %s353_s0, 4  ;;  %s167_s30 = int_to_ptr.vmem [resolvable:$true] %s166_s30 }
  0x17   :  { %v248_v10 = vpack.c.bf16 %v59_v9, %v58_v8  ;;  %245 = vmatprep.subr.bf16.mxu0 %v244_v7  ;;  %276 = vmatprep.subr.bf16.mxu1 %v244_v7  ;;  %v252_v13 = vpack.c.bf16 %v61_v12, %v60_v11  ;;  %v62_v14 = vld [vmem:[#allocation2 + $0x30] sm:$0xff]  ;;  %v64_v17 = vld [vmem:[#allocation2 + $0x40] sm:$0xff]  ;;  %v65_v18 = vld [vmem:[#allocation2 + $0x48] sm:$0xff]  ;;  %s322_s3 = scalar_lea.vmem %s167_s30, 512  ;;  %p327_p9 = scmp.lt.s32.totalorder %s167_s30, %s167_s30 }
  0x18   :  { %247 = vmatpush3.bf16.msra.mxu0 %v244_v7  ;;  %284 = vmatpush3.bf16.msra.mxu1 %v244_v7  ;;  %v256_v16 = vpack.c.bf16 %v63_v15, %v62_v14  ;;  %v260_v19 = vpack.c.bf16 %v65_v18, %v64_v17  ;;  %v66_v20 = vld [vmem:[#allocation2 + $0x50] sm:$0xff]  ;;  %v67_v21 = vld [vmem:[#allocation2 + $0x58] sm:$0xff]  ;;  %v68_v23 = vld [vmem:[#allocation2 + $0x60] sm:$0xff]  ;;  %p323_p8 = scmp.ne.s32.totalorder %s167_s30, %s322_s3  ;;  %p328_p10 = scmp.lt.s32.totalorder %s322_s3, %s322_s3 }
  0x19   :  { %42 = vperm.xlu1 %299, %v29_v3   ;;  %39 = vperm.xlu0 %298, %v28_v6   ;;  %v264_v22 = vpack.c.bf16 %v67_v21, %v66_v20  ;;  %v69_v24 = vld [vmem:[#allocation2 + $0x68] sm:$0xff]  ;;  %v70_v26 = vld [vmem:[#allocation2 + $0x70] sm:$0xff]  ;;  %v71_v27 = vld [vmem:[#allocation2 + $0x78] sm:$0xff] }
  0x1a   :  { %249 = vmatprep.subr.bf16.mxu0 %v248_v10  ;;  %277 = vmatprep.subr.bf16.mxu1 %v248_v10  ;;  %v268_v25 = vpack.c.bf16 %v69_v24, %v68_v23  ;;  %v272_v28 = vpack.c.bf16 %v71_v27, %v70_v26  ;;  %p329_p11 = por %p328_p10, %p327_p9 }
  0x1c   :  { %251 = vmatpush3.bf16.msra.mxu0 %v248_v10  ;;  %285 = vmatpush3.bf16.msra.mxu1 %v248_v10  ;;  %p330_p12 = pnand %p329_p11, %p323_p8 }
  0x1d   :  { %253 = vmatprep.subr.bf16.mxu0 %v252_v13  ;;  %278 = vmatprep.subr.bf16.mxu1 %v252_v13 }
  0x20   :  { %255 = vmatpush3.bf16.msra.mxu0 %v252_v13  ;;  %286 = vmatpush3.bf16.msra.mxu1 %v252_v13 }
  0x21   :  { %257 = vmatprep.subr.bf16.mxu0 %v256_v16  ;;  %279 = vmatprep.subr.bf16.mxu1 %v256_v16 }
  0x24   :  { %259 = vmatpush3.bf16.msra.mxu0 %v256_v16  ;;  %287 = vmatpush3.bf16.msra.mxu1 %v256_v16 }
  0x25   :  { %261 = vmatprep.subr.bf16.mxu0 %v260_v19  ;;  %280 = vmatprep.subr.bf16.mxu1 %v260_v19 }
  0x28   :  { %263 = vmatpush3.bf16.msra.mxu0 %v260_v19  ;;  %288 = vmatpush3.bf16.msra.mxu1 %v260_v19 }
  0x29   :  { %265 = vmatprep.subr.bf16.mxu0 %v264_v22  ;;  %281 = vmatprep.subr.bf16.mxu1 %v264_v22 }
  0x2c   :  { %267 = vmatpush3.bf16.msra.mxu0 %v264_v22  ;;  %289 = vmatpush3.bf16.msra.mxu1 %v264_v22 }
  0x2d   :  { %269 = vmatprep.subr.bf16.mxu0 %v268_v25  ;;  %282 = vmatprep.subr.bf16.mxu1 %v268_v25 }
  0x30   :  { %271 = vmatpush3.bf16.msra.mxu0 %v268_v25  ;;  %290 = vmatpush3.bf16.msra.mxu1 %v268_v25 }
  0x31   :  { %273 = vmatprep.subr.bf16.mxu0 %v272_v28  ;;  %283 = vmatprep.subr.bf16.mxu1 %v272_v28 }
  0x34   :  { %275 = vmatpush3.bf16.msra.mxu0 %v272_v28  ;;  %291 = vmatpush3.bf16.msra.mxu1 %v272_v28 }
  0x94   :  { %v37_v31 = vpop.permute.xlu1 %36  ;;  %v34_v32 = vpop.permute.xlu0 %33 }
  0x95   :  { %vm45_vm0 = vcmp.eq.s32.totalorder %v37_v31, %v31_v30  ;;  %vm44_vm1 = vcmp.eq.s32.totalorder %v34_v32, %v31_v30 }
  0x96   :  { %238 = vmatprep.mubr.msk.f32.mxu0 %vm44_vm1, %v352_v33 }
  0x97   :  { %239 = vmatmul.mubr.msk.f32.vlgmr.msra.gmra.mrb[0].mxu0 %vm45_vm0, %v352_v33 }
  0x98   :  { %v43_v34 = vpop.permute.xlu1 %42  ;;  %v40_v35 = vpop.permute.xlu0 %39 }
  0x99   :  { %vm47_vm2 = vcmp.eq.s32.totalorder %v43_v34, %v31_v30  ;;  %vm46_vm3 = vcmp.eq.s32.totalorder %v40_v35, %v31_v30 }
  0x9a   :  { %241 = vmatprep.mubr.msk.f32.mxu1 %vm46_vm3, %v352_v33 }
  0x9b   :  { %242 = vmatmul.mubr.msk.f32.vlgmr.msra.gmra.mrb[0].mxu1 %vm47_vm2, %v352_v33 }
 0x16a   :  { %v240_v36 = vpop.f32.mrb[0].mxu0 }
 0x16b   :  { %158 = vst [vmem:[#allocation5 + $0x8] sm:$0xff] %v240_v36  ;;  %v138_v37 = vpop.f32.mrb[1].mxu0 }
 0x16c   :  { %157 = vst [vmem:[#allocation5] sm:$0xff] %v138_v37 }
 0x16e   :  { %v243_v38 = vpop.f32.mrb[0].mxu1 }
 0x16f   :  { %160 = vst [vmem:[#allocation5 + $0x18] sm:$0xff] %v243_v38  ;;  %v148_v39 = vpop.f32.mrb[1].mxu1 }
 0x170   :  { %159 = vst [vmem:[#allocation5 + $0x10] sm:$0xff] %v148_v39 }
 0x171   :  { %333 = shalt.err (!%p330_p12)
}
 0x172   :  { %s334_s6 = scalar_lea.hbm %s413_s2, 512 }
 0x173   :  { %p335_p13 = scmp.ne.s32.totalorder %s413_s2, %s334_s6  ;;  %p338_p0 = scmp.lt.u32.totalorder %s334_s6, %s413_s2 }
 0x175   :  { %p340_p1 = pnand %p338_p0, %p335_p13 }
 0x177   :  { %343 = shalt.err (!%p340_p1)
}
 0x178   :  { %172 = dma.vmem_to_hbm [thread:$0]  %s167_s30, 512, %s413_s2, [#allocation4], %s349_s19, %s349_s19, %s350_s20  }
 0x179   :  { %346 = dma.done.wait [#allocation4], 512  }
 0x17a   :  { %347 = vsyncadd [#allocation4], 4294966784 }
 0x17b   :  { %176 = vsyncpa [#allocation3], 1 }
 0x17c   :  { %177 = vsyncpa [#allocation4], 1 }

</bundles_post_ra>
